<compile_context>
chip_gen: v7x
topology: tpu7x:2x2x1
jax: 0.10.0
libtpu: 0.0.40
codegen_flags: <defaults>
</compile_context>

<pallas_src>
import functools

import jax
import jax.numpy as jnp
from jax import lax
from jax.experimental import pallas as pl
from jax.experimental.pallas import tpu as pltpu

HIDDEN = 128
NUM_LAYERS = 6
SUBLANE_BF16 = 16  # bf16 vreg is [16, 128]


def _mlp_kernel(x_ref, w_ref, b_ref, out_ref, *, input_size):
    """x_ref: (B, input_size) f32; w_ref: (6,128,128) bf16; b_ref: (6,1,128) f32;
    out_ref: (B,128) f32 lane-dense slab."""
    # ---- Layer 0 on the VPU (fan_in is tiny): broadcast FMAs, x stays f32.
    x = x_ref[...]                                           # (B, input_size) f32
    acc = b_ref[0]                                           # (1, 128) f32
    for k in range(input_size):                              # static, tiny
        w_row = w_ref[0, k:k + 1, :].astype(jnp.float32)     # (1, 128) f32
        acc = acc + x[:, k:k + 1] * w_row                    # (B, 128) f32
    h = jnp.maximum(acc, 0.0).astype(jnp.bfloat16)

    # ---- Hidden layers 1..4: 128x128 bf16 matmuls on the MXU, f32 epilogue.
    # fori_loop (not a Python for) bounds weight-vreg live ranges; unroll=True
    # keeps LLO scheduling visibility.
    def body(i, h):
        a = jnp.dot(h, w_ref[i], preferred_element_type=jnp.float32) + b_ref[i]
        return jnp.maximum(a, 0.0).astype(jnp.bfloat16)

    h = lax.fori_loop(1, NUM_LAYERS - 1, body, h, unroll=True)

    # ---- Final layer (PyTorch `layer4`): no activation, f32 output.
    out_ref[...] = (jnp.dot(h, w_ref[NUM_LAYERS - 1],
                            preferred_element_type=jnp.float32)
                    + b_ref[NUM_LAYERS - 1])


def pack_params(params):
    """One-time packing: zero-pad each (in,out) weight to (128,128) and each
    bias to (128,), stack along a leading layer axis, cast weights to bf16.
    `params[i] = (W_t, b)` with W_t already transposed to (in, out).
    Layer order matches the PyTorch forward: layer1,2,3,5,6,4."""
    w_stack, b_stack = [], []
    for w, b in params:
        fan_in, fan_out = w.shape
        w_p = jnp.zeros((HIDDEN, HIDDEN), jnp.float32).at[:fan_in, :fan_out].set(w)
        b_p = jnp.zeros((HIDDEN,), jnp.float32).at[:fan_out].set(b)
        w_stack.append(w_p)
        b_stack.append(b_p)
    w_all = jnp.stack(w_stack).astype(jnp.bfloat16)              # (6,128,128) bf16
    b_all = jnp.stack(b_stack).reshape(NUM_LAYERS, 1, HIDDEN)    # (6,1,128)   f32
    return w_all, b_all


@functools.partial(jax.jit, static_argnames=("output_size",))
def mlp_forward(x, w_all, b_all, *, output_size):
    """x: (B, input_size) f32 (raw observations).  w_all/b_all from pack_params."""
    B0, input_size = x.shape
    # Round batch up to the bf16 sublane tile (16) so vregs are full; no-op
    # (no pad emitted) when the caller already batches in multiples of 16.
    B = ((B0 + SUBLANE_BF16 - 1) // SUBLANE_BF16) * SUBLANE_BF16
    if B != B0:
        x = jnp.zeros((B, input_size), x.dtype).at[:B0].set(x)

    vmem = pltpu.MemorySpace.VMEM
    bytes_accessed = (w_all.size * 2 + b_all.size * 4
                      + B * input_size * 4 + B * HIDDEN * 4)
    out = pl.pallas_call(
        functools.partial(_mlp_kernel, input_size=input_size),
        out_shape=jax.ShapeDtypeStruct((B, HIDDEN), jnp.float32),
        in_specs=[pl.BlockSpec(memory_space=vmem)] * 3,
        out_specs=pl.BlockSpec(memory_space=vmem),
        cost_estimate=pl.CostEstimate(
            flops=int(2 * B * HIDDEN * HIDDEN * NUM_LAYERS),
            transcendentals=0,
            bytes_accessed=int(bytes_accessed)),
    )(x, w_all, b_all)
    # Lane-dense (B,128) slab out of the kernel; slice only at the end of the jit.
    return out[:B0, :output_size]


def init_params(key, input_size, output_size):
    """Deterministic init mirroring nn.Linear shapes (weights stored transposed)."""
    dims = [(input_size, HIDDEN), (HIDDEN, HIDDEN), (HIDDEN, HIDDEN),
            (HIDDEN, HIDDEN), (HIDDEN, HIDDEN), (HIDDEN, output_size)]
    params = []
    for i, (fan_in, fan_out) in enumerate(dims):
        kw, kb, key = jax.random.split(jax.random.fold_in(key, i), 3)
        bound = 1.0 / jnp.sqrt(jnp.float32(fan_in))
        w = jax.random.uniform(kw, (fan_in, fan_out), jnp.float32, -bound, bound)
        b = jax.random.uniform(kb, (fan_out,), jnp.float32, -bound, bound)
        params.append((w, b))
    return params


def reference_forward(x, params):
    """Same math as the kernel in plain JAX: layer 0 as f32 broadcast FMAs with
    bf16-quantized weights, remaining layers as bf16 matmuls with f32 acc."""
    w0, b0 = params[0]
    w0f = w0.astype(jnp.bfloat16).astype(jnp.float32)
    acc = b0[None, :]
    for k in range(x.shape[1]):
        acc = acc + x[:, k:k + 1] * w0f[k:k + 1, :]
    h = jnp.maximum(acc, 0.0).astype(jnp.bfloat16)
    out = None
    for i in range(1, len(params)):
        w, b = params[i]
        acc = jnp.dot(h, w.astype(jnp.bfloat16),
                      preferred_element_type=jnp.float32) + b
        if i < len(params) - 1:
            h = jnp.maximum(acc, 0.0).astype(jnp.bfloat16)
        else:
            out = acc
    return out


if __name__ == "__main__":
    key = jax.random.PRNGKey(0)
    # MountainCar: 2 observations -> 3 actions.  Batch = 16 (full bf16 sublane tile).
    input_size, output_size, batch = 2, 3, 16

    kx, kp = jax.random.split(key)
    x = jax.random.normal(kx, (batch, input_size), jnp.float32)
    params = init_params(kp, input_size, output_size)
    w_all, b_all = pack_params(params)   # one-time packing, reused every step

    out = mlp_forward(x, w_all, b_all, output_size=output_size)
    out = jax.block_until_ready(out)

    ref = reference_forward(x, params)
    assert out.shape == (batch, output_size)
    assert jnp.allclose(out, ref, atol=1e-2, rtol=1e-2), "mismatch vs reference"
    print("KERNEL_OK")
</pallas_src>

<mosaic_0001>
module attributes {stable_mosaic.version = 11 : i64} {
  func.func @_mlp_kernel(%arg0: memref<16x2xf32, #tpu.memory_space<vmem>>, %arg1: memref<6x128x128xbf16, #tpu.memory_space<vmem>>, %arg2: memref<6x1x128xf32, #tpu.memory_space<vmem>>, %arg3: memref<16x128xf32, #tpu.memory_space<vmem>>) attributes {dimension_semantics = [], scalar_prefetch = 0 : i64, scratch_operands = 0 : i64, tpu.core_type = #tpu.core_type<tc>} {
    %c0 = arith.constant 0 : index
    %c0_0 = arith.constant 0 : index
    %0 = vector.load %arg0[%c0, %c0_0] : memref<16x2xf32, #tpu.memory_space<vmem>>, vector<16x2xf32>
    %c0_1 = arith.constant 0 : index
    %c0_2 = arith.constant 0 : index
    %c0_3 = arith.constant 0 : index
    %1 = vector.load %arg2[%c0_1, %c0_2, %c0_3] : memref<6x1x128xf32, #tpu.memory_space<vmem>>, vector<1x1x128xf32>
    %2 = vector.shape_cast %1 : vector<1x1x128xf32> to vector<1x128xf32>
    %c0_4 = arith.constant 0 : index
    %c0_5 = arith.constant 0 : index
    %c0_6 = arith.constant 0 : index
    %3 = vector.load %arg1[%c0_4, %c0_5, %c0_6] : memref<6x128x128xbf16, #tpu.memory_space<vmem>>, vector<1x1x128xbf16>
    %4 = vector.shape_cast %3 : vector<1x1x128xbf16> to vector<1x128xbf16>
    %5 = arith.extf %4 : vector<1x128xbf16> to vector<1x128xf32>
    %6 = vector.extract_strided_slice %0 {offsets = [0, 0], sizes = [16, 1], strides = [1, 1]} : vector<16x2xf32> to vector<16x1xf32>
    %7 = vector.broadcast %6 : vector<16x1xf32> to vector<16x128xf32>
    %8 = vector.broadcast %5 : vector<1x128xf32> to vector<16x128xf32>
    %9 = arith.mulf %7, %8 : vector<16x128xf32>
    %10 = vector.broadcast %2 : vector<1x128xf32> to vector<16x128xf32>
    %11 = arith.addf %10, %9 : vector<16x128xf32>
    %c0_7 = arith.constant 0 : index
    %c1 = arith.constant 1 : index
    %c0_8 = arith.constant 0 : index
    %12 = vector.load %arg1[%c0_7, %c1, %c0_8] : memref<6x128x128xbf16, #tpu.memory_space<vmem>>, vector<1x1x128xbf16>
    %13 = vector.shape_cast %12 : vector<1x1x128xbf16> to vector<1x128xbf16>
    %14 = arith.extf %13 : vector<1x128xbf16> to vector<1x128xf32>
    %15 = vector.extract_strided_slice %0 {offsets = [0, 1], sizes = [16, 1], strides = [1, 1]} : vector<16x2xf32> to vector<16x1xf32>
    %16 = vector.broadcast %15 : vector<16x1xf32> to vector<16x128xf32>
    %17 = vector.broadcast %14 : vector<1x128xf32> to vector<16x128xf32>
    %18 = arith.mulf %16, %17 : vector<16x128xf32>
    %19 = arith.addf %11, %18 : vector<16x128xf32>
    %cst = arith.constant 0.000000e+00 : f32
    %20 = vector.broadcast %cst : f32 to vector<16x128xf32>
    %21 = arith.maximumf %19, %20 : vector<16x128xf32>
    %22 = arith.truncf %21 : vector<16x128xf32> to vector<16x128xbf16>
    %c1_i32 = arith.constant 1 : i32
    %23 = arith.index_cast %c1_i32 : i32 to index
    %c0_9 = arith.constant 0 : index
    %c0_10 = arith.constant 0 : index
    %24 = vector.load %arg1[%23, %c0_9, %c0_10] : memref<6x128x128xbf16, #tpu.memory_space<vmem>>, vector<1x128x128xbf16>
    %25 = vector.shape_cast %24 : vector<1x128x128xbf16> to vector<128x128xbf16>
    %cst_11 = arith.constant dense<0.000000e+00> : vector<16x128xf32>
    %26 = tpu.matmul %22, %25, %cst_11 {dimension_numbers = #tpu.dot_dimension_numbers<[1], [0], [0], [1], [0, 0, 1, 1], [], []>} : vector<16x128xbf16>, vector<128x128xbf16>, vector<16x128xf32> -> vector<16x128xf32>
    %27 = arith.index_cast %c1_i32 : i32 to index
    %c0_12 = arith.constant 0 : index
    %c0_13 = arith.constant 0 : index
    %28 = vector.load %arg2[%27, %c0_12, %c0_13] : memref<6x1x128xf32, #tpu.memory_space<vmem>>, vector<1x1x128xf32>
    %29 = vector.shape_cast %28 : vector<1x1x128xf32> to vector<1x128xf32>
    %30 = vector.broadcast %29 : vector<1x128xf32> to vector<16x128xf32>
    %31 = arith.addf %26, %30 : vector<16x128xf32>
    %cst_14 = arith.constant 0.000000e+00 : f32
    %32 = vector.broadcast %cst_14 : f32 to vector<16x128xf32>
    %33 = arith.maximumf %31, %32 : vector<16x128xf32>
    %34 = arith.truncf %33 : vector<16x128xf32> to vector<16x128xbf16>
    %c2_i32 = arith.constant 2 : i32
    %35 = arith.index_cast %c2_i32 : i32 to index
    %c0_15 = arith.constant 0 : index
    %c0_16 = arith.constant 0 : index
    %36 = vector.load %arg1[%35, %c0_15, %c0_16] : memref<6x128x128xbf16, #tpu.memory_space<vmem>>, vector<1x128x128xbf16>
    %37 = vector.shape_cast %36 : vector<1x128x128xbf16> to vector<128x128xbf16>
    %cst_17 = arith.constant dense<0.000000e+00> : vector<16x128xf32>
    %38 = tpu.matmul %34, %37, %cst_17 {dimension_numbers = #tpu.dot_dimension_numbers<[1], [0], [0], [1], [0, 0, 1, 1], [], []>} : vector<16x128xbf16>, vector<128x128xbf16>, vector<16x128xf32> -> vector<16x128xf32>
    %39 = arith.index_cast %c2_i32 : i32 to index
    %c0_18 = arith.constant 0 : index
    %c0_19 = arith.constant 0 : index
    %40 = vector.load %arg2[%39, %c0_18, %c0_19] : memref<6x1x128xf32, #tpu.memory_space<vmem>>, vector<1x1x128xf32>
    %41 = vector.shape_cast %40 : vector<1x1x128xf32> to vector<1x128xf32>
    %42 = vector.broadcast %41 : vector<1x128xf32> to vector<16x128xf32>
    %43 = arith.addf %38, %42 : vector<16x128xf32>
    %cst_20 = arith.constant 0.000000e+00 : f32
    %44 = vector.broadcast %cst_20 : f32 to vector<16x128xf32>
    %45 = arith.maximumf %43, %44 : vector<16x128xf32>
    %46 = arith.truncf %45 : vector<16x128xf32> to vector<16x128xbf16>
    %c3_i32 = arith.constant 3 : i32
    %47 = arith.index_cast %c3_i32 : i32 to index
    %c0_21 = arith.constant 0 : index
    %c0_22 = arith.constant 0 : index
    %48 = vector.load %arg1[%47, %c0_21, %c0_22] : memref<6x128x128xbf16, #tpu.memory_space<vmem>>, vector<1x128x128xbf16>
    %49 = vector.shape_cast %48 : vector<1x128x128xbf16> to vector<128x128xbf16>
    %cst_23 = arith.constant dense<0.000000e+00> : vector<16x128xf32>
    %50 = tpu.matmul %46, %49, %cst_23 {dimension_numbers = #tpu.dot_dimension_numbers<[1], [0], [0], [1], [0, 0, 1, 1], [], []>} : vector<16x128xbf16>, vector<128x128xbf16>, vector<16x128xf32> -> vector<16x128xf32>
    %51 = arith.index_cast %c3_i32 : i32 to index
    %c0_24 = arith.constant 0 : index
    %c0_25 = arith.constant 0 : index
    %52 = vector.load %arg2[%51, %c0_24, %c0_25] : memref<6x1x128xf32, #tpu.memory_space<vmem>>, vector<1x1x128xf32>
    %53 = vector.shape_cast %52 : vector<1x1x128xf32> to vector<1x128xf32>
    %54 = vector.broadcast %53 : vector<1x128xf32> to vector<16x128xf32>
    %55 = arith.addf %50, %54 : vector<16x128xf32>
    %cst_26 = arith.constant 0.000000e+00 : f32
    %56 = vector.broadcast %cst_26 : f32 to vector<16x128xf32>
    %57 = arith.maximumf %55, %56 : vector<16x128xf32>
    %58 = arith.truncf %57 : vector<16x128xf32> to vector<16x128xbf16>
    %c4_i32 = arith.constant 4 : i32
    %59 = arith.index_cast %c4_i32 : i32 to index
    %c0_27 = arith.constant 0 : index
    %c0_28 = arith.constant 0 : index
    %60 = vector.load %arg1[%59, %c0_27, %c0_28] : memref<6x128x128xbf16, #tpu.memory_space<vmem>>, vector<1x128x128xbf16>
    %61 = vector.shape_cast %60 : vector<1x128x128xbf16> to vector<128x128xbf16>
    %cst_29 = arith.constant dense<0.000000e+00> : vector<16x128xf32>
    %62 = tpu.matmul %58, %61, %cst_29 {dimension_numbers = #tpu.dot_dimension_numbers<[1], [0], [0], [1], [0, 0, 1, 1], [], []>} : vector<16x128xbf16>, vector<128x128xbf16>, vector<16x128xf32> -> vector<16x128xf32>
    %63 = arith.index_cast %c4_i32 : i32 to index
    %c0_30 = arith.constant 0 : index
    %c0_31 = arith.constant 0 : index
    %64 = vector.load %arg2[%63, %c0_30, %c0_31] : memref<6x1x128xf32, #tpu.memory_space<vmem>>, vector<1x1x128xf32>
    %65 = vector.shape_cast %64 : vector<1x1x128xf32> to vector<1x128xf32>
    %66 = vector.broadcast %65 : vector<1x128xf32> to vector<16x128xf32>
    %67 = arith.addf %62, %66 : vector<16x128xf32>
    %cst_32 = arith.constant 0.000000e+00 : f32
    %68 = vector.broadcast %cst_32 : f32 to vector<16x128xf32>
    %69 = arith.maximumf %67, %68 : vector<16x128xf32>
    %70 = arith.truncf %69 : vector<16x128xf32> to vector<16x128xbf16>
    %c4_i32_33 = arith.constant 4 : i32
    %c5 = arith.constant 5 : index
    %c0_34 = arith.constant 0 : index
    %c0_35 = arith.constant 0 : index
    %71 = vector.load %arg1[%c5, %c0_34, %c0_35] : memref<6x128x128xbf16, #tpu.memory_space<vmem>>, vector<1x128x128xbf16>
    %72 = vector.shape_cast %71 : vector<1x128x128xbf16> to vector<128x128xbf16>
    %cst_36 = arith.constant dense<0.000000e+00> : vector<16x128xf32>
    %73 = tpu.matmul %70, %72, %cst_36 {dimension_numbers = #tpu.dot_dimension_numbers<[1], [0], [0], [1], [0, 0, 1, 1], [], []>} : vector<16x128xbf16>, vector<128x128xbf16>, vector<16x128xf32> -> vector<16x128xf32>
    %c5_37 = arith.constant 5 : index
    %c0_38 = arith.constant 0 : index
    %c0_39 = arith.constant 0 : index
    %74 = vector.load %arg2[%c5_37, %c0_38, %c0_39] : memref<6x1x128xf32, #tpu.memory_space<vmem>>, vector<1x1x128xf32>
    %75 = vector.shape_cast %74 : vector<1x1x128xf32> to vector<1x128xf32>
    %76 = vector.broadcast %75 : vector<1x128xf32> to vector<16x128xf32>
    %77 = arith.addf %73, %76 : vector<16x128xf32>
    %c0_40 = arith.constant 0 : index
    %c0_41 = arith.constant 0 : index
    %78 = vector.load %arg3[%c0_40, %c0_41] : memref<16x128xf32, #tpu.memory_space<vmem>>, vector<16x128xf32>
    tpu.vector_store %arg3[%c0_40, %c0_41], %77 {strides = array<i32>} : memref<16x128xf32, #tpu.memory_space<vmem>>, vector<16x128xf32>,
    return
  }
}

</mosaic_0001>

<bundles_post_ra>
// kernel: mlp_forward.1
= control target key start
LH: loop header
LB: loop body
LE: loop exit
PB: predicated region body
PF: predicated region fallthrough
CT: control target
= control target key end

     0   :  { %8 = vsyncpa [#allocation3], 0  ;;  %s936_s12 = smov [#allocation2]   ;;  %s1055_s0 = inlined_call_operand.vmem [shape: f32[16,2], index: 0, kind: input, shape index: {}]   ;;  %s1056_s1 = inlined_call_operand.hbm [shape: bf16[6,128,128], index: 1, kind: input, shape index: {}]   ;;  %s1057_s2 = inlined_call_operand.vmem [shape: f32[6,1,128], index: 2, kind: input, shape index: {}]   ;;  %s1058_s3 = inlined_call_operand.vmem [shape: f32[16,128], index: 3, kind: output, shape index: {}]  }
   0x1   :  { %s16_s13 = sshll.u32 %s936_s12, 4  ;;  %s912_s16 = scalar_lea.hbm %s1056_s1, 6144  ;;  %s17_s13 = int_to_ptr.vmem [resolvable:$true] %s16_s13 }
   0x2   :  { %p913_p0 = scmp.ne.s32.totalorder %s1056_s1, %s912_s16  ;;  %p916_p1 = scmp.lt.u32.totalorder %s912_s16, %s1056_s1 }
   0x4   :  { %p918_p2 = pnand %p916_p1, %p913_p0 }
   0x6   :  { %921 = shalt.err (!%p918_p2)
}
   0x7   :  { %s922_s21 = scalar_lea.vmem %s17_s13, 6144  ;;  %p927_p4 = scmp.lt.s32.totalorder %s17_s13, %s17_s13 }
   0x8   :  { %p923_p3 = scmp.ne.s32.totalorder %s17_s13, %s922_s21  ;;  %p928_p5 = scmp.lt.s32.totalorder %s922_s21, %s922_s21 }
   0xa   :  { %p929_p6 = por %p928_p5, %p927_p4 }
   0xc   :  { %p930_p7 = pnand %p929_p6, %p923_p3 }
   0xe   :  { %933 = shalt.err (!%p930_p7)
}
   0xf   :  { %s937_s22 = smov 64   ;;  %s938_s23 = smov 4  }
  0x10   :  { %22 = dma.hbm_to_vmem [thread:$0]  %s1056_s1, 6144, %s17_s13, [#allocation3], %s937_s22, %s937_s22, %s938_s23  }
  0x11   :  { %934 = dma.done.wait [#allocation3], 6144  }
  0x12   :  { %935 = vsyncadd [#allocation3], 4294961152  ;;  %v939_v0 = vmov 1   ;;  %v940_v1 = vmov 0   ;;  %v941_v2 = vmov 0.0   ;;  %v29_v3 = vld [vmem:[%s1055_s0] sm:$0xff]  ;;  %v44_v19 = vlaneseq }
  0x13   :  { %870 = vset.pattern.permute.xlu1 %v939_v0  ;;  %869 = vset.pattern.permute.xlu0 %v940_v1  ;;  %v872_v4 = vld [vmem:[#allocation2 + $0x40] sm:$0xff]   ;;  %v30_v5 = vld [vmem:[%s1055_s0 + $0x8] sm:$0xff]  ;;  %v874_v7 = vld [vmem:[#allocation2 + $0x50] sm:$0xff]   ;;  %vm942_vm0 = vmmov 0  }
  0x14   :  { %762 = vmatprep.subr.bf16.mxu0 %v941_v2  ;;  %782 = vmatprep.subr.bf16.mxu1 %v941_v2  ;;  %v873_v6 = vld [vmem:[#allocation2 + $0x48] sm:$0xff]   ;;  %v875_v8 = vld [vmem:[#allocation2 + $0x58] sm:$0xff]   ;;  %v876_v9 = vld [vmem:[#allocation2 + $0x60] sm:$0xff]   ;;  %v45_v20 = vshrl.u32 %v44_v19, 7 }
  0x15   :  { %59 = vperm.xlu1 %870, %v29_v3   ;;  %36 = vperm.xlu0 %869, %v29_v3   ;;  %v880_v10 = vld [vmem:[#allocation2 + $0x80] sm:$0xff]   ;;  %v877_v11 = vld [vmem:[#allocation2 + $0x68] sm:$0xff]   ;;  %v882_v13 = vld [vmem:[#allocation2 + $0x90] sm:$0xff]  }
  0x16   :  { %763 = vmatpush3.bf16.msra.mxu0 %v872_v4  ;;  %778 = vmatprep.mubr.msk.bf16.mxu0 %vm942_vm0, %v941_v2  ;;  %v881_v12 = vld [vmem:[#allocation2 + $0x88] sm:$0xff]   ;;  %v878_v14 = vld [vmem:[#allocation2 + $0x70] sm:$0xff]   ;;  %v883_v15 = vld [vmem:[#allocation2 + $0x98] sm:$0xff]   ;;  %v46_v23 = vsub.s32 0, %v45_v20  ;;  %v68_v24 = vsub.s32 1, %v45_v20 }
  0x17   :  { %764 = vmatprep.subr.bf16.mxu0 %v941_v2  ;;  %798 = vmatprep.mubr.msk.bf16.mxu1 %vm942_vm0, %v941_v2  ;;  %v879_v16 = vld [vmem:[#allocation2 + $0x78] sm:$0xff]   ;;  %v884_v17 = vld [vmem:[#allocation2 + $0xa0] sm:$0xff]   ;;  %v885_v18 = vld [vmem:[#allocation2 + $0xa8] sm:$0xff]  }
  0x18   :  { %783 = vmatpush3.bf16.msra.mxu1 %v880_v10  ;;  %v32_v21 = vld [vmem:[#allocation2] sm:$0x1]  ;;  %v886_v43 = vld [vmem:[#allocation2 + $0xb0] sm:$0xff]   ;;  %v887_v44 = vld [vmem:[#allocation2 + $0xb8] sm:$0xff]  }
  0x19   :  { %63 = vperm.xlu1 %870, %v30_v5   ;;  %41 = vperm.xlu0 %869, %v30_v5   ;;  %v33_v22 = vunpack.c.l.bf16 %v32_v21  ;;  %v666_v28 = vld [vmem:[%s1057_s2] ss:$0 sm:$0xff]  ;;  %v889_v46 = vld [vmem:[#allocation2 + $0xc8] sm:$0xff]   ;;  %v890_v47 = vld [vmem:[#allocation2 + $0xd0] sm:$0xff]  }
  0x1a   :  { %765 = vmatpush3.bf16.msra.mxu0 %v873_v6  ;;  %784 = vmatprep.subr.bf16.mxu1 %v941_v2  ;;  %v888_v45 = vld [vmem:[#allocation2 + $0xc0] sm:$0xff]   ;;  %v891_v48 = vld [vmem:[#allocation2 + $0xd8] sm:$0xff]   ;;  %v893_v50 = vld [vmem:[#allocation2 + $0xe8] sm:$0xff]  }
  0x1b   :  { %766 = vmatprep.subr.bf16.mxu0 %v941_v2  ;;  %v47_v25 = vrot.slane %v33_v22, %v46_v23  ;;  %v69_v26 = vrot.slane %v33_v22, %v68_v24  ;;  %v892_v49 = vld [vmem:[#allocation2 + $0xe0] sm:$0xff]   ;;  %v894_v61 = vld [vmem:[#allocation2 + $0xf0] sm:$0xff]   ;;  %v895_v62 = vld [vmem:[#allocation2 + $0xf8] sm:$0xff]  }
  0x1c   :  { %785 = vmatpush3.bf16.msra.mxu1 %v881_v12  ;;  %v668_v51 = vld [vmem:[%s1057_s2 + $0x1] ss:$0 sm:$0xff]  ;;  %v898_v1 = vld [vmem:[#allocation2 + $0x110] sm:$0xff]   ;;  %v899_v3 = vld [vmem:[#allocation2 + $0x118] sm:$0xff]  }
  0x1d   :  { %871 = vset.pattern.permute.xlu0 %v939_v0  ;;  %786 = vmatprep.subr.bf16.mxu1 %v941_v2  ;;  %v896_v63 = vld [vmem:[#allocation2 + $0x100] sm:$0xff]   ;;  %v897_v0 = vld [vmem:[#allocation2 + $0x108] sm:$0xff]   ;;  %v906_v20 = vld [vmem:[#allocation2 + $0x150] sm:$0xff]  }
  0x1e   :  { %767 = vmatpush3.bf16.msra.mxu0 %v874_v7  ;;  %v900_v4 = vld [vmem:[#allocation2 + $0x120] sm:$0xff]   ;;  %v901_v5 = vld [vmem:[#allocation2 + $0x128] sm:$0xff]   ;;  %v907_v21 = vld [vmem:[#allocation2 + $0x158] sm:$0xff]  }
  0x1f   :  { %768 = vmatprep.subr.bf16.mxu0 %v941_v2  ;;  %v678_v6 = vld [vmem:[%s1057_s2 + $0x2] ss:$0 sm:$0xff]  ;;  %v905_v19 = vld [vmem:[#allocation2 + $0x148] sm:$0xff]   ;;  %v688_v24 = vld [vmem:[%s1057_s2 + $0x3] ss:$0 sm:$0xff] }
  0x20   :  { %787 = vmatpush3.bf16.msra.mxu1 %v882_v13  ;;  %v908_v22 = vld [vmem:[#allocation2 + $0x160] sm:$0xff]   ;;  %v909_v23 = vld [vmem:[#allocation2 + $0x168] sm:$0xff]  }
  0x21   :  { %788 = vmatprep.subr.bf16.mxu1 %v941_v2 }
  0x22   :  { %769 = vmatpush3.bf16.msra.mxu0 %v875_v8 }
  0x23   :  { %770 = vmatprep.subr.bf16.mxu0 %v941_v2 }
  0x24   :  { %789 = vmatpush3.bf16.msra.mxu1 %v883_v15 }
  0x25   :  { %790 = vmatprep.subr.bf16.mxu1 %v941_v2 }
  0x26   :  { %771 = vmatpush3.bf16.msra.mxu0 %v876_v9 }
  0x27   :  { %772 = vmatprep.subr.bf16.mxu0 %v941_v2 }
  0x28   :  { %791 = vmatpush3.bf16.msra.mxu1 %v884_v17  ;;  %v903_v17 = vld [vmem:[#allocation2 + $0x138] sm:$0xff]  }
  0x29   :  { %792 = vmatprep.subr.bf16.mxu1 %v941_v2 }
  0x2a   :  { %773 = vmatpush3.bf16.msra.mxu0 %v877_v11 }
  0x2b   :  { %774 = vmatprep.subr.bf16.mxu0 %v941_v2 }
  0x2c   :  { %793 = vmatpush3.bf16.msra.mxu1 %v885_v18  ;;  %v904_v18 = vld [vmem:[#allocation2 + $0x140] sm:$0xff]  }
  0x2d   :  { %794 = vmatprep.subr.bf16.mxu1 %v941_v2 }
  0x2e   :  { %775 = vmatpush3.bf16.msra.mxu0 %v878_v14 }
  0x2f   :  { %776 = vmatprep.subr.bf16.mxu0 %v941_v2 }
  0x30   :  { %795 = vmatpush3.bf16.msra.mxu1 %v886_v43 }
  0x31   :  { %796 = vmatprep.subr.bf16.mxu1 %v941_v2 }
  0x32   :  { %777 = vmatpush3.bf16.msra.mxu0 %v879_v16  ;;  %v902_v16 = vld [vmem:[#allocation2 + $0x130] sm:$0xff]  }
  0x33   :  { %802 = vmatprep.subr.bf16.mxu0 %v941_v2 }
  0x34   :  { %797 = vmatpush3.bf16.msra.mxu1 %v887_v44 }
  0x35   :  { %822 = vmatprep.subr.bf16.mxu1 %v941_v2 }
  0x94   :  { %v60_v27 = vpop.permute.xlu1 %59  ;;  %v37_v29 = vpop.permute.xlu0 %36 }
  0x95   :  { %v48_v30 = vmul.f32 %v47_v25, %v37_v29  ;;  %v70_v31 = vmul.f32 %v69_v26, %v60_v27 }
  0x97   :  { %v56_v32 = vadd.f32 %v666_v28, %v48_v30 }
  0x98   :  { %v64_v33 = vpop.permute.xlu1 %63  ;;  %v42_v34 = vpop.permute.xlu0 %41 }
  0x99   :  { %v49_v35 = vmul.f32 %v47_v25, %v42_v34  ;;  %v72_v36 = vadd.f32 %v70_v31, %v56_v32  ;;  %v71_v37 = vmul.f32 %v69_v26, %v64_v33  ;;  %v910_v34 = vld [vmem:[#allocation2 + $0x170] sm:$0xff]  }
  0x9b   :  { %v57_v38 = vadd.f32 %v666_v28, %v49_v35  ;;  %v74_v40 = vmax.f32 %v72_v36, 0.0  ;;  %v911_v35 = vld [vmem:[#allocation2 + $0x178] sm:$0xff]   ;;  %v698_v36 = vld [vmem:[%s1057_s2 + $0x4] ss:$0 sm:$0xff] }
  0x9d   :  { %v73_v39 = vadd.f32 %v71_v37, %v57_v38 }
  0x9f   :  { %v75_v41 = vmax.f32 %v73_v39, 0.0 }
  0xa1   :  { %v76_v42 = vpack.c.bf16 %v75_v41, %v74_v40 }
  0xa3   :  { %779 = vmatmul.mubr.bf16.vlgmr.msra.gmra.mrb[0].mxu0 %v76_v42 }
  0xa4   :  { %818 = vmatprep.mubr.msk.bf16.mxu0 %vm942_vm0, %v941_v2  ;;  %803 = vmatpush3.bf16.msra.mxu0 %v888_v45 }
  0xa5   :  { %804 = vmatprep.subr.bf16.mxu0 %v941_v2 }
  0xa8   :  { %805 = vmatpush3.bf16.msra.mxu0 %v889_v46 }
  0xa9   :  { %806 = vmatprep.subr.bf16.mxu0 %v941_v2 }
  0xac   :  { %807 = vmatpush3.bf16.msra.mxu0 %v890_v47 }
  0xad   :  { %808 = vmatprep.subr.bf16.mxu0 %v941_v2 }
  0xb0   :  { %809 = vmatpush3.bf16.msra.mxu0 %v891_v48 }
  0xb1   :  { %810 = vmatprep.subr.bf16.mxu0 %v941_v2 }
  0xb4   :  { %811 = vmatpush3.bf16.msra.mxu0 %v892_v49 }
  0xb5   :  { %812 = vmatprep.subr.bf16.mxu0 %v941_v2 }
  0xb8   :  { %813 = vmatpush3.bf16.msra.mxu0 %v893_v50 }
  0xb9   :  { %814 = vmatprep.subr.bf16.mxu0 %v941_v2 }
  0xbc   :  { %815 = vmatpush3.bf16.msra.mxu0 %v894_v61 }
  0xbd   :  { %816 = vmatprep.subr.bf16.mxu0 %v941_v2 }
  0xc0   :  { %817 = vmatpush3.bf16.msra.mxu0 %v895_v62 }
  0xc1   :  { %842 = vmatprep.subr.bf16.mxu0 %v941_v2 }
 0x176   :  { %v184_v52 = vpop.f32.mrb[0].mxu0 }
 0x177   :  { %v185_v53 = vadd.f32 %v668_v51, %v184_v52  ;;  %v780_v54 = vpop.f32.mrb[1].mxu0 }
 0x178   :  { %v187_v55 = vpop.f32.mrb[2].mxu0 }
 0x179   :  { %v188_v56 = vadd.f32 %v668_v51, %v187_v55  ;;  %v781_v57 = vpop.f32.mrb[3].mxu0  ;;  %v191_v58 = vmax.f32 %v185_v53, 0.0 }
 0x17b   :  { %v192_v59 = vmax.f32 %v188_v56, 0.0 }
 0x17d   :  { %v193_v60 = vpack.c.bf16 %v192_v59, %v191_v58 }
 0x17f   :  { %799 = vmatmul.mubr.bf16.vlgmr.msra.gmra.mrb[0].mxu1 %v193_v60 }
 0x180   :  { %838 = vmatprep.mubr.msk.bf16.mxu1 %vm942_vm0, %v941_v2  ;;  %823 = vmatpush3.bf16.msra.mxu1 %v896_v63 }
 0x181   :  { %824 = vmatprep.subr.bf16.mxu1 %v941_v2 }
 0x184   :  { %825 = vmatpush3.bf16.msra.mxu1 %v897_v0 }
 0x185   :  { %826 = vmatprep.subr.bf16.mxu1 %v941_v2 }
 0x188   :  { %827 = vmatpush3.bf16.msra.mxu1 %v898_v1 }
 0x189   :  { %828 = vmatprep.subr.bf16.mxu1 %v941_v2 }
 0x18c   :  { %829 = vmatpush3.bf16.msra.mxu1 %v899_v3 }
 0x18d   :  { %830 = vmatprep.subr.bf16.mxu1 %v941_v2 }
 0x190   :  { %831 = vmatpush3.bf16.msra.mxu1 %v900_v4 }
 0x191   :  { %832 = vmatprep.subr.bf16.mxu1 %v941_v2 }
 0x194   :  { %833 = vmatpush3.bf16.msra.mxu1 %v901_v5 }
 0x195   :  { %834 = vmatprep.subr.bf16.mxu1 %v941_v2 }
 0x198   :  { %835 = vmatpush3.bf16.msra.mxu1 %v902_v16 }
 0x199   :  { %836 = vmatprep.subr.bf16.mxu1 %v941_v2 }
 0x19c   :  { %837 = vmatpush3.bf16.msra.mxu1 %v903_v17 }
 0x252   :  { %v301_v7 = vpop.f32.mrb[0].mxu1 }
 0x253   :  { %v302_v8 = vadd.f32 %v678_v6, %v301_v7  ;;  %v800_v9 = vpop.f32.mrb[1].mxu1 }
 0x254   :  { %v304_v10 = vpop.f32.mrb[2].mxu1 }
 0x255   :  { %v305_v11 = vadd.f32 %v678_v6, %v304_v10  ;;  %v801_v12 = vpop.f32.mrb[3].mxu1  ;;  %v308_v13 = vmax.f32 %v302_v8, 0.0 }
 0x257   :  { %v309_v14 = vmax.f32 %v305_v11, 0.0 }
 0x259   :  { %v310_v15 = vpack.c.bf16 %v309_v14, %v308_v13 }
 0x25b   :  { %819 = vmatmul.mubr.bf16.vlgmr.msra.gmra.mrb[4].mxu0 %v310_v15 }
 0x25c   :  { %858 = vmatprep.mubr.msk.bf16.mxu0 %vm942_vm0, %v941_v2  ;;  %843 = vmatpush3.bf16.msra.mxu0 %v904_v18 }
 0x25d   :  { %844 = vmatprep.subr.bf16.mxu0 %v941_v2 }
 0x260   :  { %845 = vmatpush3.bf16.msra.mxu0 %v905_v19 }
 0x261   :  { %846 = vmatprep.subr.bf16.mxu0 %v941_v2 }
 0x264   :  { %847 = vmatpush3.bf16.msra.mxu0 %v906_v20 }
 0x265   :  { %848 = vmatprep.subr.bf16.mxu0 %v941_v2 }
 0x268   :  { %849 = vmatpush3.bf16.msra.mxu0 %v907_v21 }
 0x269   :  { %850 = vmatprep.subr.bf16.mxu0 %v941_v2 }
 0x26c   :  { %851 = vmatpush3.bf16.msra.mxu0 %v908_v22 }
 0x26d   :  { %852 = vmatprep.subr.bf16.mxu0 %v941_v2 }
 0x270   :  { %853 = vmatpush3.bf16.msra.mxu0 %v909_v23 }
 0x271   :  { %854 = vmatprep.subr.bf16.mxu0 %v941_v2 }
 0x274   :  { %855 = vmatpush3.bf16.msra.mxu0 %v910_v34 }
 0x275   :  { %856 = vmatprep.subr.bf16.mxu0 %v941_v2  ;;  %v708_v2 = vld [vmem:[%s1057_s2 + $0x5] ss:$0 sm:$0xff] }
 0x278   :  { %857 = vmatpush3.bf16.msra.mxu0 %v911_v35 }
 0x32e   :  { %v418_v25 = vpop.f32.mrb[4].mxu0 }
 0x32f   :  { %v419_v26 = vadd.f32 %v688_v24, %v418_v25  ;;  %v820_v27 = vpop.f32.mrb[5].mxu0 }
 0x330   :  { %v421_v28 = vpop.f32.mrb[6].mxu0 }
 0x331   :  { %v422_v29 = vadd.f32 %v688_v24, %v421_v28  ;;  %v821_v30 = vpop.f32.mrb[7].mxu0  ;;  %v425_v31 = vmax.f32 %v419_v26, 0.0 }
 0x333   :  { %v426_v32 = vmax.f32 %v422_v29, 0.0 }
 0x335   :  { %v427_v33 = vpack.c.bf16 %v426_v32, %v425_v31 }
 0x337   :  { %839 = vmatmul.mubr.bf16.vlgmr.msra.gmra.mrb[4].mxu1 %v427_v33 }
 0x40a   :  { %v535_v37 = vpop.f32.mrb[4].mxu1 }
 0x40b   :  { %v536_v38 = vadd.f32 %v698_v36, %v535_v37  ;;  %v840_v39 = vpop.f32.mrb[5].mxu1 }
 0x40c   :  { %v538_v40 = vpop.f32.mrb[6].mxu1 }
 0x40d   :  { %v539_v41 = vadd.f32 %v698_v36, %v538_v40  ;;  %v841_v42 = vpop.f32.mrb[7].mxu1  ;;  %v542_v43 = vmax.f32 %v536_v38, 0.0 }
 0x40f   :  { %v543_v44 = vmax.f32 %v539_v41, 0.0 }
 0x411   :  { %v544_v45 = vpack.c.bf16 %v543_v44, %v542_v43 }
 0x413   :  { %859 = vmatmul.mubr.bf16.vlgmr.msra.gmra.mrb[8].mxu0 %v544_v45 }
 0x4e6   :  { %v652_v46 = vpop.f32.mrb[8].mxu0 }
 0x4e7   :  { %v653_v47 = vadd.f32 %v708_v2, %v652_v46  ;;  %v860_v48 = vpop.f32.mrb[9].mxu0 }
 0x4e8   :  { %v655_v49 = vpop.f32.mrb[10].mxu0 }
 0x4e9   :  { %659 = vst [vmem:[%s1058_s3] sm:$0xff] %v653_v47  ;;  %v656_v50 = vadd.f32 %v708_v2, %v655_v49  ;;  %v861_v51 = vpop.f32.mrb[11].mxu0 }
 0x4eb   :  { %660 = vst [vmem:[%s1058_s3 + $0x8] sm:$0xff] %v656_v50 }
 0x4ec   :  { %665 = vsyncpa [#allocation3], 1 }

</bundles_post_ra>
